<compile_context>
chip_gen: v5e
topology: v5e:2x2
jax: 0.10.0
libtpu: 0.0.40
codegen_flags: <defaults>
</compile_context>

<pallas_src>
import jax
import jax.numpy as jnp
from jax.experimental import pallas as pl
from jax.experimental.pallas import tpu as pltpu


def _round_up(v, m):
    return (v + m - 1) // m * m


def _patch_proj_kernel(p_ref, w_ref, b_ref, o_ref):
    # p_ref: (TM, Kp)  w_ref: (Kp, TN)  b_ref: (1, TN)  o_ref: (TM, TN)
    acc = jnp.dot(p_ref[...], w_ref[...], preferred_element_type=jnp.float32)
    o_ref[...] = (acc + b_ref[...]).astype(o_ref.dtype)


def patch_embed_forward(x, weight, bias, patch_size, stride, *,
                        flatten=True, compute_dtype=None,
                        tile_m=512, tile_n=1024):
    """Pallas implementation of PatchEmbed.forward.

    x:       (B, C, H, W) float, NCHW like PyTorch.
    weight:  (D, C, ph, pw)  nn.Conv2d weight layout.
    bias:    (D,)
    compute_dtype: dtype fed to the MXU (e.g. jnp.bfloat16). Accumulation is
                   always f32; the output keeps x.dtype.  None -> x.dtype.
    tile_m / tile_n: row / column tiles of the (M = B*L, D) output grid.
    returns (B, L, D) if flatten else (B, D, gh, gw).
    """
    B, C, H, W = x.shape
    D, _, ph, pw = weight.shape
    gh = (H - ph) // stride + 1
    gw = (W - pw) // stride + 1
    L = gh * gw
    M = B * L
    K = C * ph * pw

    out_dtype = x.dtype
    compute_dtype = out_dtype if compute_dtype is None else jnp.dtype(compute_dtype)

    # ---- glue: patch extraction (data movement only) -----------------------
    if stride == ph and stride == pw and H % ph == 0 and W % pw == 0:
        # Non-overlapping patches: free metadata reshape.
        xp = x.reshape(B, C, gh, ph, gw, pw)
    else:
        # General / overlapping stride: one gather instead of gh*gw slices.
        hi = (jnp.arange(gh) * stride)[:, None] + jnp.arange(ph)[None, :]   # (gh, ph)
        wi = (jnp.arange(gw) * stride)[:, None] + jnp.arange(pw)[None, :]   # (gw, pw)
        xp = x[:, :, hi[:, :, None, None], wi[None, None, :, :]]            # (B,C,gh,ph,gw,pw)
    # (B, gh, gw, C, ph, pw) -> (M, K), K-order = (C, ph, pw) like conv weight
    patches = xp.transpose(0, 2, 4, 1, 3, 5).reshape(M, K)

    # conv weight -> matmul weight (K, D); bias -> f32 (1, D) row
    w_mat = weight.reshape(D, K).T
    b_mat = bias.reshape(1, D).astype(jnp.float32)

    # ---- pad to (8,128)-aligned, lane-dense tiles ---------------------------
    tm = min(int(tile_m), _round_up(M, 8))            # row tile
    Mp = _round_up(M, tm)
    Kp = _round_up(K, 128)                            # lane-dense contraction dim
    Dp0 = _round_up(D, 128)
    tn = min(_round_up(int(tile_n), 128), Dp0)        # output-column tile
    Dp = _round_up(D, tn)                             # lane-dense output dim

    patches_p = jnp.pad(patches, ((0, Mp - M), (0, Kp - K))).astype(compute_dtype)
    w_pad = jnp.pad(w_mat, ((0, Kp - K), (0, Dp - D))).astype(compute_dtype)
    b_pad = jnp.pad(b_mat, ((0, 0), (0, Dp - D)))

    in_sz = jnp.dtype(compute_dtype).itemsize
    out_sz = jnp.dtype(out_dtype).itemsize

    # double-buffered (patch, weight, bias, out) tiles + headroom
    vmem_bytes = (2 * tm * Kp * in_sz + 2 * Kp * tn * in_sz
                  + 2 * tm * tn * out_sz + 2 * tn * 4)
    vmem_limit = int(min(64 * 1024 * 1024,
                         max(2 * vmem_bytes + (2 << 20), 16 * 1024 * 1024)))

    cost = pl.CostEstimate(
        flops=2 * Mp * Kp * Dp,
        transcendentals=0,
        bytes_accessed=(Mp * Kp * in_sz
                        + (Mp // tm) * Kp * Dp * in_sz    # weight re-read per row tile
                        + Dp * 4 + Mp * Dp * out_sz),
    )

    out = pl.pallas_call(
        _patch_proj_kernel,
        out_shape=jax.ShapeDtypeStruct((Mp, Dp), out_dtype),
        grid=(Mp // tm, Dp // tn),
        in_specs=[
            pl.BlockSpec((tm, Kp), lambda i, j: (i, 0)),   # streamed row tiles
            pl.BlockSpec((Kp, tn), lambda i, j: (0, j)),   # weight column tile
            pl.BlockSpec((1, tn), lambda i, j: (0, j)),    # bias column tile
        ],
        out_specs=pl.BlockSpec((tm, tn), lambda i, j: (i, j)),
        compiler_params=pltpu.CompilerParams(
            dimension_semantics=("parallel", "parallel"),  # megacore split on v7x
            vmem_limit_bytes=vmem_limit,
            # Allow XLA to fuse the patch transpose / pad / cast into the input
            # DMA of this call instead of materialising (M, K) in HBM.
            allow_input_fusion=[True, False, False],
        ),
        cost_estimate=cost,
    )(patches_p, w_pad, b_pad)

    out = out[:M, :D].reshape(B, L, D)    # == conv_out.flatten(2).transpose(1, 2)
    if not flatten:
        out = out.reshape(B, gh, gw, D).transpose(0, 3, 1, 2)
    # norm = Identity (norm_layer=None)
    return out


def _reference(x, weight, bias, stride, flatten=True):
    # Pure-JAX reference using the actual convolution, for verification.
    y = jax.lax.conv_general_dilated(
        x, weight, window_strides=(stride, stride), padding="VALID",
        dimension_numbers=("NCHW", "OIHW", "NCHW"))
    y = y + bias.reshape(1, -1, 1, 1)
    if flatten:
        B, D, gh, gw = y.shape
        y = y.reshape(B, D, gh * gw).transpose(0, 2, 1)
    return y


if __name__ == "__main__":
    # Small shapes consistent with the module:
    # img_size=16, patch_size=4, stride=4, in_chans=4, embed_dim=32, batch=2
    B, C, H, W = 2, 4, 16, 16
    ph = pw = 4
    stride = 4
    D = 32

    key = jax.random.PRNGKey(0)
    kx, kw, kb = jax.random.split(key, 3)
    x = jax.random.normal(kx, (B, C, H, W), dtype=jnp.float32)
    fan_in = C * ph * pw
    weight = jax.random.normal(kw, (D, C, ph, pw), dtype=jnp.float32) / jnp.sqrt(fan_in)
    bias = jax.random.normal(kb, (D,), dtype=jnp.float32) * 0.02

    # 1) f32 MXU path, non-overlapping stride (the Vim default: stride == patch)
    out = patch_embed_forward(x, weight, bias, (ph, pw), stride, flatten=True)
    out = jax.block_until_ready(out)
    ref = _reference(x, weight, bias, stride, flatten=True)
    assert out.shape == (B, (H // stride) * (W // stride), D), out.shape
    assert jnp.allclose(out, ref, atol=1e-4, rtol=1e-4), \
        float(jnp.max(jnp.abs(out - ref)))

    # 2) bf16 MXU inputs with f32 accumulation (halves HBM bytes on the patch
    #    stream); tolerance loosened for bf16 input rounding.
    out_bf16 = patch_embed_forward(x, weight, bias, (ph, pw), stride,
                                   flatten=True, compute_dtype=jnp.bfloat16)
    out_bf16 = jax.block_until_ready(out_bf16)
    assert jnp.allclose(out_bf16, ref, atol=5e-2, rtol=5e-2), \
        float(jnp.max(jnp.abs(out_bf16 - ref)))

    # 3) overlapping-stride path (single-gather extraction) vs the conv reference
    ph2 = pw2 = 8
    stride2 = 4
    w2 = jax.random.normal(kw, (D, C, ph2, pw2), dtype=jnp.float32) / jnp.sqrt(C * ph2 * pw2)
    out2 = patch_embed_forward(x, w2, bias, (ph2, pw2), stride2, flatten=True)
    out2 = jax.block_until_ready(out2)
    ref2 = _reference(x, w2, bias, stride2, flatten=True)
    gh2 = (H - ph2) // stride2 + 1
    assert out2.shape == (B, gh2 * gh2, D), out2.shape
    assert jnp.allclose(out2, ref2, atol=1e-4, rtol=1e-4), \
        float(jnp.max(jnp.abs(out2 - ref2)))

    # 4) flatten=False path: (B, D, gh, gw) like the conv output.
    out_nf = patch_embed_forward(x, weight, bias, (ph, pw), stride, flatten=False)
    out_nf = jax.block_until_ready(out_nf)
    ref_nf = _reference(x, weight, bias, stride, flatten=False)
    assert out_nf.shape == ref_nf.shape, out_nf.shape
    assert jnp.allclose(out_nf, ref_nf, atol=1e-4, rtol=1e-4), \
        float(jnp.max(jnp.abs(out_nf - ref_nf)))

    print("KERNEL_OK")
</pallas_src>

<mosaic_0001>
module attributes {stable_mosaic.version = 11 : i64} {
  func.func @_patch_proj_kernel(%arg0: i32, %arg1: i32, %arg2: memref<32x128xf32, #tpu.memory_space<vmem>>, %arg3: memref<128x128xf32, #tpu.memory_space<vmem>>, %arg4: memref<1x128xf32, #tpu.memory_space<vmem>>, %arg5: memref<32x128xf32, #tpu.memory_space<vmem>>) attributes {dimension_semantics = [#tpu.dimension_semantics<parallel>, #tpu.dimension_semantics<parallel>], iteration_bounds = array<i64: 1, 1>, scalar_prefetch = 0 : i64, scratch_operands = 0 : i64, tpu.core_type = #tpu.core_type<tc>, window_params = [{transform_indices = @transform_0, window_bounds = array<i64: 32, 128>}, {transform_indices = @transform_1, window_bounds = array<i64: 128, 128>}, {transform_indices = @transform_2, window_bounds = array<i64: 1, 128>}, {transform_indices = @transform_3, window_bounds = array<i64: 32, 128>}]} {
    %c0 = arith.constant 0 : index
    %c0_0 = arith.constant 0 : index
    %0 = vector.load %arg2[%c0, %c0_0] : memref<32x128xf32, #tpu.memory_space<vmem>>, vector<32x128xf32>
    %c0_1 = arith.constant 0 : index
    %c0_2 = arith.constant 0 : index
    %1 = vector.load %arg3[%c0_1, %c0_2] : memref<128x128xf32, #tpu.memory_space<vmem>>, vector<128x128xf32>
    %cst = arith.constant dense<0.000000e+00> : vector<32x128xf32>
    %2 = tpu.matmul %0, %1, %cst {dimension_numbers = #tpu.dot_dimension_numbers<[1], [0], [0], [1], [0, 0, 1, 1], [], []>} : vector<32x128xf32>, vector<128x128xf32>, vector<32x128xf32> -> vector<32x128xf32>
    %c0_3 = arith.constant 0 : index
    %c0_4 = arith.constant 0 : index
    %3 = vector.load %arg4[%c0_3, %c0_4] : memref<1x128xf32, #tpu.memory_space<vmem>>, vector<1x128xf32>
    %4 = vector.broadcast %3 : vector<1x128xf32> to vector<32x128xf32>
    %5 = arith.addf %2, %4 : vector<32x128xf32>
    %c0_5 = arith.constant 0 : index
    %c0_6 = arith.constant 0 : index
    %6 = vector.load %arg5[%c0_5, %c0_6] : memref<32x128xf32, #tpu.memory_space<vmem>>, vector<32x128xf32>
    tpu.vector_store %arg5[%c0_5, %c0_6], %5 {strides = array<i32>} : memref<32x128xf32, #tpu.memory_space<vmem>>, vector<32x128xf32>,
    return
  }
  func.func @transform_0(%arg0: i32, %arg1: i32) -> (i32, i32) {
    %c0_i32 = arith.constant 0 : i32
    %c0_i32_0 = arith.constant 0 : i32
    return %arg0, %c0_i32 : i32, i32
  }
  func.func @transform_1(%arg0: i32, %arg1: i32) -> (i32, i32) {
    %c0_i32 = arith.constant 0 : i32
    %c0_i32_0 = arith.constant 0 : i32
    return %c0_i32, %arg1 : i32, i32
  }
  func.func @transform_2(%arg0: i32, %arg1: i32) -> (i32, i32) {
    %c0_i32 = arith.constant 0 : i32
    %c0_i32_0 = arith.constant 0 : i32
    return %c0_i32, %arg1 : i32, i32
  }
  func.func @transform_3(%arg0: i32, %arg1: i32) -> (i32, i32) {
    %c0_i32 = arith.constant 0 : i32
    return %arg0, %arg1 : i32, i32
  }
}

</mosaic_0001>

<bundles_post_ra>
// kernel: tpu_custom_call.1
= control target key start
LH: loop header
LB: loop body
LE: loop exit
PB: predicated region body
PF: predicated region fallthrough
CT: control target
= control target key end

     0   :  { %8 = vsyncpa [#allocation3], 0  ;;  %s302_s0 = inlined_call_operand.hbm [shape: f32[32,128], index: 0, kind: input, shape index: {}]   ;;  %s303_s1 = inlined_call_operand.hbm [shape: f32[128,128], index: 1, kind: input, shape index: {}]   ;;  %s304_s2 = inlined_call_operand.vmem [shape: f32[1,128], index: 2, kind: input, shape index: {}]   ;;  %s305_s3 = inlined_call_operand.hbm [shape: f32[32,128], index: 3, kind: output, shape index: {}]  }
   0x1   :  { %9 = vsyncpa [#allocation6], 0 }
   0x2   :  { %10 = vsyncpa [#allocation4], 0  ;;  %s15_s14 = sshll.u32 %s302_s0, 4  ;;  %s256_s15 = smov [#allocation2]   ;;  %s16_s14 = int_to_ptr.hbm [resolvable:$true] %s15_s14 }
   0x3   :  { %s17_s16 = sshll.u32 %s256_s15, 4  ;;  %s28_s19 = sshll.u32 %s303_s1, 4  ;;  %s18_s16 = int_to_ptr.vmem [resolvable:$true] %s17_s16  ;;  %s29_s19 = int_to_ptr.hbm [resolvable:$true] %s28_s19 }
   0x4   :  { %s257_s20 = smov 128   ;;  %s258_s21 = smov 8  }
   0x5   :  { %23 = dma.hbm_to_vmem [thread:$0]  %s16_s14, 512, %s18_s16, [#allocation3], %s257_s20, %s257_s20, %s258_s21  }
   0x6   :  { %s259_s22 = smov [#allocation5]  }
   0x7   :  { %s30_s23 = sshll.u32 %s259_s22, 4  ;;  %s31_s23 = int_to_ptr.vmem [resolvable:$true] %s30_s23 }
   0x8   :  { %36 = dma.hbm_to_vmem [thread:$0]  %s29_s19, 2048, %s31_s23, [#allocation6], %s257_s20, %s257_s20, %s258_s21  }
   0x9   :  { %250 = dma.done.wait [#allocation3], 512  }
   0xa   :  { %251 = vsyncadd [#allocation3], 4294966784 }
   0xb   :  { %252 = dma.done.wait [#allocation6], 2048  }
   0xc   :  { %253 = vsyncadd [#allocation6], 4294965248  ;;  %v66_v0 = vld [vmem:[#allocation5 + $0x78] sm:$0xff]  ;;  %v65_v1 = vld [vmem:[#allocation5 + $0x70] sm:$0xff]  ;;  %s260_s24 = smov [#allocation7]   ;;  %s110_s28 = sshll.u32 %s305_s3, 4  ;;  %s111_s28 = int_to_ptr.hbm [resolvable:$true] %s110_s28 }
   0xd   :  { %125 = vmatpush.msra.mxu2 %v66_v0  ;;  %126 = vmatpush.msra.mxu3 %v66_v0  ;;  %v64_v2 = vld [vmem:[#allocation5 + $0x68] sm:$0xff]  ;;  %v63_v3 = vld [vmem:[#allocation5 + $0x60] sm:$0xff]  ;;  %v62_v4 = vld [vmem:[#allocation5 + $0x58] sm:$0xff]  ;;  %s108_s25 = sshll.u32 %s260_s24, 4  ;;  %s109_s25 = int_to_ptr.vmem [resolvable:$true] %s108_s25 }
   0xe   :  { %71 = vmatpush.msra.mxu0 %v66_v0  ;;  %124 = vmatpush.msra.mxu1 %v66_v0  ;;  %v61_v5 = vld [vmem:[#allocation5 + $0x50] sm:$0xff]  ;;  %v60_v6 = vld [vmem:[#allocation5 + $0x48] sm:$0xff]  ;;  %v59_v7 = vld [vmem:[#allocation5 + $0x40] sm:$0xff] }
   0xf   :  { %128 = vmatpush.msra.mxu2 %v65_v1  ;;  %129 = vmatpush.msra.mxu3 %v65_v1  ;;  %v58_v8 = vld [vmem:[#allocation5 + $0x38] sm:$0xff]  ;;  %v57_v9 = vld [vmem:[#allocation5 + $0x30] sm:$0xff]  ;;  %v56_v10 = vld [vmem:[#allocation5 + $0x28] sm:$0xff] }
  0x10   :  { %72 = vmatpush.msra.mxu0 %v65_v1  ;;  %127 = vmatpush.msra.mxu1 %v65_v1  ;;  %v55_v11 = vld [vmem:[#allocation5 + $0x20] sm:$0xff]  ;;  %v54_v12 = vld [vmem:[#allocation5 + $0x18] sm:$0xff]  ;;  %v53_v13 = vld [vmem:[#allocation5 + $0x10] sm:$0xff] }
  0x11   :  { %131 = vmatpush.msra.mxu2 %v64_v2  ;;  %132 = vmatpush.msra.mxu3 %v64_v2  ;;  %v52_v14 = vld [vmem:[#allocation5 + $0x8] sm:$0xff]  ;;  %v51_v15 = vld [vmem:[#allocation5] sm:$0xff]  ;;  %v49_v16 = vld [vmem:[#allocation2 + $0x10] sm:$0xff] }
  0x12   :  { %73 = vmatpush.msra.mxu0 %v64_v2  ;;  %130 = vmatpush.msra.mxu1 %v64_v2  ;;  %v50_v17 = vld [vmem:[#allocation2 + $0x18] sm:$0xff]  ;;  %v47_v18 = vld [vmem:[#allocation2] sm:$0xff]  ;;  %v48_v19 = vld [vmem:[#allocation2 + $0x8] sm:$0xff] }
  0x13   :  { %134 = vmatpush.msra.mxu2 %v63_v3  ;;  %135 = vmatpush.msra.mxu3 %v63_v3  ;;  %v177_v20 = vld [vmem:[%s304_s2] ss:$0 sm:$0xff] }
  0x14   :  { %74 = vmatpush.msra.mxu0 %v63_v3  ;;  %133 = vmatpush.msra.mxu1 %v63_v3 }
  0x15   :  { %137 = vmatpush.msra.mxu2 %v62_v4  ;;  %138 = vmatpush.msra.mxu3 %v62_v4 }
  0x16   :  { %75 = vmatpush.msra.mxu0 %v62_v4  ;;  %136 = vmatpush.msra.mxu1 %v62_v4 }
  0x17   :  { %140 = vmatpush.msra.mxu2 %v61_v5  ;;  %141 = vmatpush.msra.mxu3 %v61_v5 }
  0x18   :  { %76 = vmatpush.msra.mxu0 %v61_v5  ;;  %139 = vmatpush.msra.mxu1 %v61_v5 }
  0x19   :  { %143 = vmatpush.msra.mxu2 %v60_v6  ;;  %144 = vmatpush.msra.mxu3 %v60_v6 }
  0x1a   :  { %77 = vmatpush.msra.mxu0 %v60_v6  ;;  %142 = vmatpush.msra.mxu1 %v60_v6 }
  0x1b   :  { %146 = vmatpush.msra.mxu2 %v59_v7  ;;  %147 = vmatpush.msra.mxu3 %v59_v7 }
  0x1c   :  { %78 = vmatpush.msra.mxu0 %v59_v7  ;;  %145 = vmatpush.msra.mxu1 %v59_v7 }
  0x1d   :  { %149 = vmatpush.msra.mxu2 %v58_v8  ;;  %150 = vmatpush.msra.mxu3 %v58_v8 }
  0x1e   :  { %79 = vmatpush.msra.mxu0 %v58_v8  ;;  %148 = vmatpush.msra.mxu1 %v58_v8 }
  0x1f   :  { %152 = vmatpush.msra.mxu2 %v57_v9  ;;  %153 = vmatpush.msra.mxu3 %v57_v9 }
  0x20   :  { %80 = vmatpush.msra.mxu0 %v57_v9  ;;  %151 = vmatpush.msra.mxu1 %v57_v9 }
  0x21   :  { %155 = vmatpush.msra.mxu2 %v56_v10  ;;  %156 = vmatpush.msra.mxu3 %v56_v10 }
  0x22   :  { %81 = vmatpush.msra.mxu0 %v56_v10  ;;  %154 = vmatpush.msra.mxu1 %v56_v10 }
  0x23   :  { %158 = vmatpush.msra.mxu2 %v55_v11  ;;  %159 = vmatpush.msra.mxu3 %v55_v11 }
  0x24   :  { %82 = vmatpush.msra.mxu0 %v55_v11  ;;  %157 = vmatpush.msra.mxu1 %v55_v11 }
  0x25   :  { %161 = vmatpush.msra.mxu2 %v54_v12  ;;  %162 = vmatpush.msra.mxu3 %v54_v12 }
  0x26   :  { %83 = vmatpush.msra.mxu0 %v54_v12  ;;  %160 = vmatpush.msra.mxu1 %v54_v12 }
  0x27   :  { %164 = vmatpush.msra.mxu2 %v53_v13  ;;  %165 = vmatpush.msra.mxu3 %v53_v13 }
  0x28   :  { %84 = vmatpush.msra.mxu0 %v53_v13  ;;  %163 = vmatpush.msra.mxu1 %v53_v13 }
  0x29   :  { %167 = vmatpush.msra.mxu2 %v52_v14  ;;  %168 = vmatpush.msra.mxu3 %v52_v14 }
  0x2a   :  { %85 = vmatpush.msra.mxu0 %v52_v14  ;;  %166 = vmatpush.msra.mxu1 %v52_v14 }
  0x2b   :  { %170 = vmatpush.msra.mxu2 %v51_v15  ;;  %171 = vmatpush.msra.mxu3 %v51_v15 }
  0x2c   :  { %93 = vmatmul.f32.vlgmr.msra.gmra.mxu2 %v49_v16  ;;  %96 = vmatmul.f32.vlgmr.msra.gmra.mxu3 %v50_v17 }
  0x2d   :  { %86 = vmatpush.msra.mxu0 %v51_v15  ;;  %169 = vmatpush.msra.mxu1 %v51_v15 }
  0x2e   :  { %87 = vmatmul.f32.vlgmr.msra.gmra.mxu0 %v47_v18  ;;  %90 = vmatmul.f32.vlgmr.msra.gmra.mxu1 %v48_v19 }
  0xab   :  { %v88_v21 = vpop.f32.mrf.mxu0  ;;  %v91_v22 = vpop.f32.mrf.mxu1 }
  0xac   :  { %v89_v23 = vadd.f32 %v177_v20, %v88_v21  ;;  %v92_v24 = vadd.f32 %v177_v20, %v91_v22 }
  0xae   :  { %100 = vst [vmem:[#allocation7] sm:$0xff] %v89_v23 }
  0xaf   :  { %101 = vst [vmem:[#allocation7 + $0x8] sm:$0xff] %v92_v24  ;;  %v94_v25 = vpop.f32.mrf.mxu2  ;;  %v97_v26 = vpop.f32.mrf.mxu3 }
  0xb0   :  { %v95_v27 = vadd.f32 %v177_v20, %v94_v25  ;;  %v98_v28 = vadd.f32 %v177_v20, %v97_v26 }
  0xb2   :  { %102 = vst [vmem:[#allocation7 + $0x10] sm:$0xff] %v95_v27 }
  0xb3   :  { %103 = vst [vmem:[#allocation7 + $0x18] sm:$0xff] %v98_v28 }
  0xb4   :  { %116 = dma.vmem_to_hbm [thread:$0]  %s109_s25, 512, %s111_s28, [#allocation4], %s257_s20, %s257_s20, %s258_s21  }
  0xb5   :  { %254 = dma.done.wait [#allocation4], 512  }
  0xb6   :  { %255 = vsyncadd [#allocation4], 4294966784 }
  0xb7   :  { %121 = vsyncpa [#allocation3], 1 }
  0xb8   :  { %122 = vsyncpa [#allocation6], 1 }
  0xb9   :  { %123 = vsyncpa [#allocation4], 1 }

</bundles_post_ra>
